<compile_context>
chip_gen: v6e
topology: v6e:2x2x1
jax: 0.10.0
libtpu: 0.0.40
codegen_flags: <defaults>
</compile_context>

<pallas_src>
import functools

import jax
import jax.numpy as jnp
from jax.experimental import pallas as pl
from jax.experimental.pallas import tpu as pltpu

# ---------------- model dimensions (small, Barlow-Twins-like) ----------------
BATCH = 8
CHANNELS = 4
HEIGHT = 8
WIDTH = 8
IN_FLAT = CHANNELS * HEIGHT * WIDTH   # 256
NUM_FTRS = 128                         # embedding dim (before projection head)
PROJ_HIDDEN = 256                      # hidden dim of projection head
OUT_DIM = 128                          # output dim of projection head
BN_EPS = 1e-5


def _bn_relu(h, gamma, beta):
    """BatchNorm1d (training-mode batch stats, biased variance) + ReLU.

    One-pass statistics: E[h] and E[h^2] computed with two back-to-back
    sublane reductions; var = E[h^2] - E[h]^2.  All math in f32.
    """
    inv_n = 1.0 / h.shape[0]
    s = jnp.sum(h, axis=0, keepdims=True)
    ss = jnp.sum(h * h, axis=0, keepdims=True)
    mean = s * inv_n
    var = ss * inv_n - mean * mean
    h_norm = (h - mean) * jax.lax.rsqrt(var + BN_EPS)
    return jnp.maximum(h_norm * gamma + beta, 0.0)


def _make_kernel(with_features):
    """Build the fused kernel; `with_features` toggles the feat output ref."""

    def kernel(
        x_ref,                     # (B, C*H*W) flattened NCHW input, one view
        wb_ref, bb_ref,            # backbone "conv-as-linear" weight (bf16) / bias
        w1_ref, g1_ref, be1_ref,   # block 1: linear (no bias, bf16), BN gamma/beta
        w2_ref, g2_ref, be2_ref,   # block 2: linear (no bias, bf16), BN gamma/beta
        w3_ref, b3_ref,            # block 3: linear (bf16) + bias
        *out_refs,                 # (out_ref,) or (out_ref, feat_ref)
    ):
        out_ref = out_refs[0]

        x = x_ref[...].astype(jnp.bfloat16)

        # ---- backbone: Conv2d(C, num_ftrs, kernel=(H,W)) == Linear over flat NCHW
        f = jnp.dot(x, wb_ref[...], preferred_element_type=jnp.float32) + bb_ref[...]
        if with_features:
            out_refs[1][...] = f.astype(out_refs[1].dtype)

        # ---- projection head, block 1: Linear(no bias) -> BN -> ReLU
        h = jnp.dot(f.astype(jnp.bfloat16), w1_ref[...],
                    preferred_element_type=jnp.float32)
        h = _bn_relu(h, g1_ref[...], be1_ref[...])

        # ---- block 2: Linear(no bias) -> BN -> ReLU
        h = jnp.dot(h.astype(jnp.bfloat16), w2_ref[...],
                    preferred_element_type=jnp.float32)
        h = _bn_relu(h, g2_ref[...], be2_ref[...])

        # ---- block 3: Linear(+bias)
        out = jnp.dot(h.astype(jnp.bfloat16), w3_ref[...],
                      preferred_element_type=jnp.float32) + b3_ref[...]
        out_ref[...] = out.astype(out_ref.dtype)

    return kernel


def _fused_forward(params, xs, with_features):
    """One pallas_call for all views.

    xs: (V, B, C*H*W). Grid iterates over the view axis; weights use constant
    block indices so they are DMA'd once and stay VMEM-resident.
    """
    v_views, b = xs.shape[0], xs.shape[1]

    x_spec = pl.BlockSpec((None, b, IN_FLAT), lambda v: (v, 0, 0))

    def w_spec(shape):
        # Constant block index -> single DMA, resident across grid steps.
        return pl.BlockSpec(shape, lambda v: (0, 0))

    in_specs = [
        x_spec,
        w_spec((IN_FLAT, NUM_FTRS)), w_spec((1, NUM_FTRS)),
        w_spec((NUM_FTRS, PROJ_HIDDEN)), w_spec((1, PROJ_HIDDEN)), w_spec((1, PROJ_HIDDEN)),
        w_spec((PROJ_HIDDEN, PROJ_HIDDEN)), w_spec((1, PROJ_HIDDEN)), w_spec((1, PROJ_HIDDEN)),
        w_spec((PROJ_HIDDEN, OUT_DIM)), w_spec((1, OUT_DIM)),
    ]

    out_spec = pl.BlockSpec((None, b, OUT_DIM), lambda v: (v, 0, 0))
    if with_features:
        out_shape = (
            jax.ShapeDtypeStruct((v_views, b, OUT_DIM), jnp.float32),
            jax.ShapeDtypeStruct((v_views, b, NUM_FTRS), jnp.float32),
        )
        out_specs = (out_spec, pl.BlockSpec((None, b, NUM_FTRS), lambda v: (v, 0, 0)))
    else:
        out_shape = jax.ShapeDtypeStruct((v_views, b, OUT_DIM), jnp.float32)
        out_specs = out_spec

    return pl.pallas_call(
        _make_kernel(with_features),
        out_shape=out_shape,
        grid=(v_views,),
        in_specs=in_specs,
        out_specs=out_specs,
        compiler_params=pltpu.CompilerParams(
            dimension_semantics=("parallel",),   # views shard across TCs on v7x
            vmem_limit_bytes=4 << 20,            # footprint is < 1 MiB
        ),
    )(
        xs,
        params["wb"], params["bb"],
        params["w1"], params["g1"], params["be1"],
        params["w2"], params["g2"], params["be2"],
        params["w3"], params["b3"],
    )


@functools.partial(jax.jit, static_argnames=("return_features",))
def barlow_twins_forward(params, x0, x1=None, return_features=False):
    """Mirrors BarlowTwins.forward semantics (per-view BN statistics)."""
    b = x0.shape[0]
    x0_flat = x0.reshape(b, -1)  # NCHW flatten, start_dim=1
    if x1 is None:
        xs = x0_flat[None]
    else:
        xs = jnp.stack([x0_flat, x1.reshape(b, -1)], axis=0)

    if return_features:
        out_all, feat_all = _fused_forward(params, xs, True)
        res0 = (out_all[0], feat_all[0])
        if x1 is None:
            return res0
        return res0, (out_all[1], feat_all[1])
    else:
        out_all = _fused_forward(params, xs, False)
        if x1 is None:
            return out_all[0]
        return out_all[0], out_all[1]


def init_params(key):
    """Deterministic parameter init (PyTorch-style scale ~ 1/sqrt(fan_in)).

    Matmul weights stored bf16 (MXU-native, half the DMA bytes); biases and BN
    affine params stay f32.
    """
    ks = jax.random.split(key, 8)

    def lin_w(k, fan_in, fan_out):
        bound = 1.0 / jnp.sqrt(fan_in)
        w = jax.random.uniform(k, (fan_in, fan_out), jnp.float32, -bound, bound)
        return w.astype(jnp.bfloat16)

    def lin_b(k, fan_in, fan_out):
        bound = 1.0 / jnp.sqrt(fan_in)
        return jax.random.uniform(k, (1, fan_out), jnp.float32, -bound, bound)

    return {
        # backbone (Conv2d with full-size kernel, expressed as a linear)
        "wb": lin_w(ks[0], IN_FLAT, NUM_FTRS),
        "bb": lin_b(ks[1], IN_FLAT, NUM_FTRS),
        # projection head block 1 (Linear no-bias, BN affine)
        "w1": lin_w(ks[2], NUM_FTRS, PROJ_HIDDEN),
        "g1": jnp.ones((1, PROJ_HIDDEN), jnp.float32),
        "be1": jnp.zeros((1, PROJ_HIDDEN), jnp.float32),
        # block 2
        "w2": lin_w(ks[3], PROJ_HIDDEN, PROJ_HIDDEN),
        "g2": jnp.ones((1, PROJ_HIDDEN), jnp.float32),
        "be2": jnp.zeros((1, PROJ_HIDDEN), jnp.float32),
        # block 3 (Linear with bias)
        "w3": lin_w(ks[4], PROJ_HIDDEN, OUT_DIM),
        "b3": lin_b(ks[5], PROJ_HIDDEN, OUT_DIM),
    }


def _reference_single(params, x):
    """Pure-JAX f32 reference (same bf16-stored weights, f32 activations)."""
    b = x.shape[0]
    xf = x.reshape(b, -1).astype(jnp.float32)
    f = xf @ params["wb"].astype(jnp.float32) + params["bb"]

    def bn_relu(h, g, be):
        mean = jnp.mean(h, axis=0, keepdims=True)
        var = jnp.mean((h - mean) ** 2, axis=0, keepdims=True)
        return jnp.maximum((h - mean) / jnp.sqrt(var + BN_EPS) * g + be, 0.0)

    h = bn_relu(f @ params["w1"].astype(jnp.float32), params["g1"], params["be1"])
    h = bn_relu(h @ params["w2"].astype(jnp.float32), params["g2"], params["be2"])
    out = h @ params["w3"].astype(jnp.float32) + params["b3"]
    return out, f


if __name__ == "__main__":
    import numpy as np

    key = jax.random.PRNGKey(0)
    kp, k0, k1 = jax.random.split(key, 3)

    params = init_params(kp)
    x0 = jax.random.normal(k0, (BATCH, CHANNELS, HEIGHT, WIDTH), jnp.float32)
    x1 = jax.random.normal(k1, (BATCH, CHANNELS, HEIGHT, WIDTH), jnp.float32)

    # two inputs, two outputs (the BarlowTwins two-view path) — one pallas_call
    out0, out1 = barlow_twins_forward(params, x0, x1)
    jax.block_until_ready((out0, out1))

    # single input with return_features=True
    out_s, feat_s = barlow_twins_forward(params, x0, None, return_features=True)
    jax.block_until_ready((out_s, feat_s))

    assert out0.shape == (BATCH, OUT_DIM)
    assert out1.shape == (BATCH, OUT_DIM)
    assert out_s.shape == (BATCH, OUT_DIM)
    assert feat_s.shape == (BATCH, NUM_FTRS)

    # Loose-tolerance check vs. pure-JAX f32 reference (bf16 MXU operands).
    ref0, reff0 = _reference_single(params, x0)
    ref1, _ = _reference_single(params, x1)
    assert np.allclose(np.asarray(out0), np.asarray(ref0), atol=5e-2, rtol=5e-2)
    assert np.allclose(np.asarray(out1), np.asarray(ref1), atol=5e-2, rtol=5e-2)
    assert np.allclose(np.asarray(out_s), np.asarray(ref0), atol=5e-2, rtol=5e-2)
    assert np.allclose(np.asarray(feat_s), np.asarray(reff0), atol=5e-2, rtol=5e-2)

    print("KERNEL_OK")
</pallas_src>

<mosaic_0001>
module attributes {stable_mosaic.version = 11 : i64} {
  func.func @kernel(%arg0: i32, %arg1: memref<1x8x256xf32, #tpu.memory_space<vmem>>, %arg2: memref<256x128xbf16, #tpu.memory_space<vmem>>, %arg3: memref<1x128xf32, #tpu.memory_space<vmem>>, %arg4: memref<128x256xbf16, #tpu.memory_space<vmem>>, %arg5: memref<1x256xf32, #tpu.memory_space<vmem>>, %arg6: memref<1x256xf32, #tpu.memory_space<vmem>>, %arg7: memref<256x256xbf16, #tpu.memory_space<vmem>>, %arg8: memref<1x256xf32, #tpu.memory_space<vmem>>, %arg9: memref<1x256xf32, #tpu.memory_space<vmem>>, %arg10: memref<256x128xbf16, #tpu.memory_space<vmem>>, %arg11: memref<1x128xf32, #tpu.memory_space<vmem>>, %arg12: memref<1x8x128xf32, #tpu.memory_space<vmem>>) attributes {dimension_semantics = [#tpu.dimension_semantics<parallel>], iteration_bounds = array<i64: 2>, scalar_prefetch = 0 : i64, scratch_operands = 0 : i64, tpu.core_type = #tpu.core_type<tc>, window_params = [{transform_indices = @transform_0, window_bounds = array<i64: 1, 8, 256>}, {pipeline_mode = #tpu.pipeline_mode<synchronous>, transform_indices = @transform_1, window_bounds = array<i64: 256, 128>}, {pipeline_mode = #tpu.pipeline_mode<synchronous>, transform_indices = @transform_2, window_bounds = array<i64: 1, 128>}, {pipeline_mode = #tpu.pipeline_mode<synchronous>, transform_indices = @transform_3, window_bounds = array<i64: 128, 256>}, {pipeline_mode = #tpu.pipeline_mode<synchronous>, transform_indices = @transform_4, window_bounds = array<i64: 1, 256>}, {pipeline_mode = #tpu.pipeline_mode<synchronous>, transform_indices = @transform_5, window_bounds = array<i64: 1, 256>}, {pipeline_mode = #tpu.pipeline_mode<synchronous>, transform_indices = @transform_6, window_bounds = array<i64: 256, 256>}, {pipeline_mode = #tpu.pipeline_mode<synchronous>, transform_indices = @transform_7, window_bounds = array<i64: 1, 256>}, {pipeline_mode = #tpu.pipeline_mode<synchronous>, transform_indices = @transform_8, window_bounds = array<i64: 1, 256>}, {pipeline_mode = #tpu.pipeline_mode<synchronous>, transform_indices = @transform_9, window_bounds = array<i64: 256, 128>}, {pipeline_mode = #tpu.pipeline_mode<synchronous>, transform_indices = @transform_10, window_bounds = array<i64: 1, 128>}, {transform_indices = @transform_11, window_bounds = array<i64: 1, 8, 128>}]} {
    %c0 = arith.constant 0 : index
    %c0_0 = arith.constant 0 : index
    %c0_1 = arith.constant 0 : index
    %0 = vector.load %arg1[%c0, %c0_0, %c0_1] : memref<1x8x256xf32, #tpu.memory_space<vmem>>, vector<1x8x256xf32>
    %1 = vector.shape_cast %0 : vector<1x8x256xf32> to vector<8x256xf32>
    %2 = arith.truncf %1 : vector<8x256xf32> to vector<8x256xbf16>
    %c0_2 = arith.constant 0 : index
    %c0_3 = arith.constant 0 : index
    %3 = vector.load %arg2[%c0_2, %c0_3] : memref<256x128xbf16, #tpu.memory_space<vmem>>, vector<256x128xbf16>
    %cst = arith.constant dense<0.000000e+00> : vector<8x128xf32>
    %4 = tpu.matmul %2, %3, %cst {dimension_numbers = #tpu.dot_dimension_numbers<[1], [0], [0], [1], [0, 0, 1, 1], [], []>} : vector<8x256xbf16>, vector<256x128xbf16>, vector<8x128xf32> -> vector<8x128xf32>
    %c0_4 = arith.constant 0 : index
    %c0_5 = arith.constant 0 : index
    %5 = vector.load %arg3[%c0_4, %c0_5] : memref<1x128xf32, #tpu.memory_space<vmem>>, vector<1x128xf32>
    %6 = vector.broadcast %5 : vector<1x128xf32> to vector<8x128xf32>
    %7 = arith.addf %4, %6 : vector<8x128xf32>
    %8 = arith.truncf %7 : vector<8x128xf32> to vector<8x128xbf16>
    %c0_6 = arith.constant 0 : index
    %c0_7 = arith.constant 0 : index
    %9 = vector.load %arg4[%c0_6, %c0_7] : memref<128x256xbf16, #tpu.memory_space<vmem>>, vector<128x256xbf16>
    %cst_8 = arith.constant dense<0.000000e+00> : vector<8x256xf32>
    %10 = tpu.matmul %8, %9, %cst_8 {dimension_numbers = #tpu.dot_dimension_numbers<[1], [0], [0], [1], [0, 0, 1, 1], [], []>} : vector<8x128xbf16>, vector<128x256xbf16>, vector<8x256xf32> -> vector<8x256xf32>
    %c0_9 = arith.constant 0 : index
    %c0_10 = arith.constant 0 : index
    %11 = vector.load %arg5[%c0_9, %c0_10] : memref<1x256xf32, #tpu.memory_space<vmem>>, vector<1x256xf32>
    %c0_11 = arith.constant 0 : index
    %c0_12 = arith.constant 0 : index
    %12 = vector.load %arg6[%c0_11, %c0_12] : memref<1x256xf32, #tpu.memory_space<vmem>>, vector<1x256xf32>
    %cst_13 = arith.constant dense<0.000000e+00> : vector<256xf32>
    %13 = vector.multi_reduction <add>, %10, %cst_13 [0] : vector<8x256xf32> to vector<256xf32>
    %14 = vector.shape_cast %13 : vector<256xf32> to vector<1x256xf32>
    %15 = arith.mulf %10, %10 : vector<8x256xf32>
    %cst_14 = arith.constant dense<0.000000e+00> : vector<256xf32>
    %16 = vector.multi_reduction <add>, %15, %cst_14 [0] : vector<8x256xf32> to vector<256xf32>
    %17 = vector.shape_cast %16 : vector<256xf32> to vector<1x256xf32>
    %cst_15 = arith.constant 1.250000e-01 : f32
    %18 = vector.broadcast %cst_15 : f32 to vector<1x256xf32>
    %19 = arith.mulf %14, %18 : vector<1x256xf32>
    %cst_16 = arith.constant 1.250000e-01 : f32
    %20 = vector.broadcast %cst_16 : f32 to vector<1x256xf32>
    %21 = arith.mulf %17, %20 : vector<1x256xf32>
    %22 = arith.mulf %19, %19 : vector<1x256xf32>
    %23 = arith.subf %21, %22 : vector<1x256xf32>
    %24 = vector.broadcast %19 : vector<1x256xf32> to vector<8x256xf32>
    %25 = arith.subf %10, %24 : vector<8x256xf32>
    %cst_17 = arith.constant 9.99999974E-6 : f32
    %26 = vector.broadcast %cst_17 : f32 to vector<1x256xf32>
    %27 = arith.addf %23, %26 : vector<1x256xf32>
    %28 = math.rsqrt %27 : vector<1x256xf32>
    %29 = vector.broadcast %28 : vector<1x256xf32> to vector<8x256xf32>
    %30 = arith.mulf %25, %29 : vector<8x256xf32>
    %31 = vector.broadcast %11 : vector<1x256xf32> to vector<8x256xf32>
    %32 = arith.mulf %30, %31 : vector<8x256xf32>
    %33 = vector.broadcast %12 : vector<1x256xf32> to vector<8x256xf32>
    %34 = arith.addf %32, %33 : vector<8x256xf32>
    %cst_18 = arith.constant 0.000000e+00 : f32
    %35 = vector.broadcast %cst_18 : f32 to vector<8x256xf32>
    %36 = arith.maximumf %34, %35 : vector<8x256xf32>
    %37 = arith.truncf %36 : vector<8x256xf32> to vector<8x256xbf16>
    %c0_19 = arith.constant 0 : index
    %c0_20 = arith.constant 0 : index
    %38 = vector.load %arg7[%c0_19, %c0_20] : memref<256x256xbf16, #tpu.memory_space<vmem>>, vector<256x256xbf16>
    %cst_21 = arith.constant dense<0.000000e+00> : vector<8x256xf32>
    %39 = tpu.matmul %37, %38, %cst_21 {dimension_numbers = #tpu.dot_dimension_numbers<[1], [0], [0], [1], [0, 0, 1, 1], [], []>} : vector<8x256xbf16>, vector<256x256xbf16>, vector<8x256xf32> -> vector<8x256xf32>
    %c0_22 = arith.constant 0 : index
    %c0_23 = arith.constant 0 : index
    %40 = vector.load %arg8[%c0_22, %c0_23] : memref<1x256xf32, #tpu.memory_space<vmem>>, vector<1x256xf32>
    %c0_24 = arith.constant 0 : index
    %c0_25 = arith.constant 0 : index
    %41 = vector.load %arg9[%c0_24, %c0_25] : memref<1x256xf32, #tpu.memory_space<vmem>>, vector<1x256xf32>
    %cst_26 = arith.constant dense<0.000000e+00> : vector<256xf32>
    %42 = vector.multi_reduction <add>, %39, %cst_26 [0] : vector<8x256xf32> to vector<256xf32>
    %43 = vector.shape_cast %42 : vector<256xf32> to vector<1x256xf32>
    %44 = arith.mulf %39, %39 : vector<8x256xf32>
    %cst_27 = arith.constant dense<0.000000e+00> : vector<256xf32>
    %45 = vector.multi_reduction <add>, %44, %cst_27 [0] : vector<8x256xf32> to vector<256xf32>
    %46 = vector.shape_cast %45 : vector<256xf32> to vector<1x256xf32>
    %cst_28 = arith.constant 1.250000e-01 : f32
    %47 = vector.broadcast %cst_28 : f32 to vector<1x256xf32>
    %48 = arith.mulf %43, %47 : vector<1x256xf32>
    %cst_29 = arith.constant 1.250000e-01 : f32
    %49 = vector.broadcast %cst_29 : f32 to vector<1x256xf32>
    %50 = arith.mulf %46, %49 : vector<1x256xf32>
    %51 = arith.mulf %48, %48 : vector<1x256xf32>
    %52 = arith.subf %50, %51 : vector<1x256xf32>
    %53 = vector.broadcast %48 : vector<1x256xf32> to vector<8x256xf32>
    %54 = arith.subf %39, %53 : vector<8x256xf32>
    %cst_30 = arith.constant 9.99999974E-6 : f32
    %55 = vector.broadcast %cst_30 : f32 to vector<1x256xf32>
    %56 = arith.addf %52, %55 : vector<1x256xf32>
    %57 = math.rsqrt %56 : vector<1x256xf32>
    %58 = vector.broadcast %57 : vector<1x256xf32> to vector<8x256xf32>
    %59 = arith.mulf %54, %58 : vector<8x256xf32>
    %60 = vector.broadcast %40 : vector<1x256xf32> to vector<8x256xf32>
    %61 = arith.mulf %59, %60 : vector<8x256xf32>
    %62 = vector.broadcast %41 : vector<1x256xf32> to vector<8x256xf32>
    %63 = arith.addf %61, %62 : vector<8x256xf32>
    %cst_31 = arith.constant 0.000000e+00 : f32
    %64 = vector.broadcast %cst_31 : f32 to vector<8x256xf32>
    %65 = arith.maximumf %63, %64 : vector<8x256xf32>
    %66 = arith.truncf %65 : vector<8x256xf32> to vector<8x256xbf16>
    %c0_32 = arith.constant 0 : index
    %c0_33 = arith.constant 0 : index
    %67 = vector.load %arg10[%c0_32, %c0_33] : memref<256x128xbf16, #tpu.memory_space<vmem>>, vector<256x128xbf16>
    %cst_34 = arith.constant dense<0.000000e+00> : vector<8x128xf32>
    %68 = tpu.matmul %66, %67, %cst_34 {dimension_numbers = #tpu.dot_dimension_numbers<[1], [0], [0], [1], [0, 0, 1, 1], [], []>} : vector<8x256xbf16>, vector<256x128xbf16>, vector<8x128xf32> -> vector<8x128xf32>
    %c0_35 = arith.constant 0 : index
    %c0_36 = arith.constant 0 : index
    %69 = vector.load %arg11[%c0_35, %c0_36] : memref<1x128xf32, #tpu.memory_space<vmem>>, vector<1x128xf32>
    %70 = vector.broadcast %69 : vector<1x128xf32> to vector<8x128xf32>
    %71 = arith.addf %68, %70 : vector<8x128xf32>
    %c0_37 = arith.constant 0 : index
    %c0_38 = arith.constant 0 : index
    %c0_39 = arith.constant 0 : index
    %72 = vector.load %arg12[%c0_37, %c0_38, %c0_39] : memref<1x8x128xf32, #tpu.memory_space<vmem>>, vector<1x8x128xf32>
    %73 = vector.shape_cast %72 : vector<1x8x128xf32> to vector<8x128xf32>
    %74 = vector.shape_cast %71 : vector<8x128xf32> to vector<1x8x128xf32>
    tpu.vector_store %arg12[%c0_37, %c0_38, %c0_39], %74 {strides = array<i32>} : memref<1x8x128xf32, #tpu.memory_space<vmem>>, vector<1x8x128xf32>,
    return
  }
  func.func @transform_0(%arg0: i32) -> (i32, i32, i32) {
    %c0_i32 = arith.constant 0 : i32
    %c0_i32_0 = arith.constant 0 : i32
    %c0_i32_1 = arith.constant 0 : i32
    return %arg0, %c0_i32, %c0_i32_0 : i32, i32, i32
  }
  func.func @transform_1(%arg0: i32) -> (i32, i32) {
    %c0_i32 = arith.constant 0 : i32
    %c0_i32_0 = arith.constant 0 : i32
    %c0_i32_1 = arith.constant 0 : i32
    return %c0_i32, %c0_i32_0 : i32, i32
  }
  func.func @transform_2(%arg0: i32) -> (i32, i32) {
    %c0_i32 = arith.constant 0 : i32
    %c0_i32_0 = arith.constant 0 : i32
    %c0_i32_1 = arith.constant 0 : i32
    return %c0_i32, %c0_i32_0 : i32, i32
  }
  func.func @transform_3(%arg0: i32) -> (i32, i32) {
    %c0_i32 = arith.constant 0 : i32
    %c0_i32_0 = arith.constant 0 : i32
    %c0_i32_1 = arith.constant 0 : i32
    return %c0_i32, %c0_i32_0 : i32, i32
  }
  func.func @transform_4(%arg0: i32) -> (i32, i32) {
    %c0_i32 = arith.constant 0 : i32
    %c0_i32_0 = arith.constant 0 : i32
    %c0_i32_1 = arith.constant 0 : i32
    return %c0_i32, %c0_i32_0 : i32, i32
  }
  func.func @transform_5(%arg0: i32) -> (i32, i32) {
    %c0_i32 = arith.constant 0 : i32
    %c0_i32_0 = arith.constant 0 : i32
    %c0_i32_1 = arith.constant 0 : i32
    return %c0_i32, %c0_i32_0 : i32, i32
  }
  func.func @transform_6(%arg0: i32) -> (i32, i32) {
    %c0_i32 = arith.constant 0 : i32
    %c0_i32_0 = arith.constant 0 : i32
    %c0_i32_1 = arith.constant 0 : i32
    return %c0_i32, %c0_i32_0 : i32, i32
  }
  func.func @transform_7(%arg0: i32) -> (i32, i32) {
    %c0_i32 = arith.constant 0 : i32
    %c0_i32_0 = arith.constant 0 : i32
    %c0_i32_1 = arith.constant 0 : i32
    return %c0_i32, %c0_i32_0 : i32, i32
  }
  func.func @transform_8(%arg0: i32) -> (i32, i32) {
    %c0_i32 = arith.constant 0 : i32
    %c0_i32_0 = arith.constant 0 : i32
    %c0_i32_1 = arith.constant 0 : i32
    return %c0_i32, %c0_i32_0 : i32, i32
  }
  func.func @transform_9(%arg0: i32) -> (i32, i32) {
    %c0_i32 = arith.constant 0 : i32
    %c0_i32_0 = arith.constant 0 : i32
    %c0_i32_1 = arith.constant 0 : i32
    return %c0_i32, %c0_i32_0 : i32, i32
  }
  func.func @transform_10(%arg0: i32) -> (i32, i32) {
    %c0_i32 = arith.constant 0 : i32
    %c0_i32_0 = arith.constant 0 : i32
    %c0_i32_1 = arith.constant 0 : i32
    return %c0_i32, %c0_i32_0 : i32, i32
  }
  func.func @transform_11(%arg0: i32) -> (i32, i32, i32) {
    %c0_i32 = arith.constant 0 : i32
    %c0_i32_0 = arith.constant 0 : i32
    %c0_i32_1 = arith.constant 0 : i32
    return %arg0, %c0_i32, %c0_i32_0 : i32, i32, i32
  }
}

</mosaic_0001>

<bundles_post_ra>
// kernel: barlow_twins_forward.1
= control target key start
LH: loop header
LB: loop body
LE: loop exit
PB: predicated region body
PF: predicated region fallthrough
CT: control target
= control target key end

     0   :  { %16 = vsyncpa [#allocation3], 0  ;;  %s2059_s0 = inlined_call_operand.vmem [shape: f32[2,8,256], index: 0, kind: input, shape index: {}]   ;;  %s2060_s1 = inlined_call_operand.hbm [shape: bf16[256,128], index: 1, kind: input, shape index: {}]   ;;  %s2061_s2 = inlined_call_operand.vmem [shape: f32[1,128], index: 2, kind: input, shape index: {}]   ;;  %s2062_s3 = inlined_call_operand.hbm [shape: bf16[128,256], index: 3, kind: input, shape index: {}]   ;;  %s2063_s4 = inlined_call_operand.vmem [shape: f32[1,256], index: 4, kind: input, shape index: {}]   ;;  %s2064_s5 = inlined_call_operand.vmem [shape: f32[1,256], index: 5, kind: input, shape index: {}]   ;;  %s2065_s6 = inlined_call_operand.vmem [shape: bf16[256,256], index: 6, kind: input, shape index: {}]   ;;  %s2066_s7 = inlined_call_operand.vmem [shape: f32[1,256], index: 7, kind: input, shape index: {}]   ;;  %s2067_s8 = inlined_call_operand.vmem [shape: f32[1,256], index: 8, kind: input, shape index: {}]   ;;  %s2068_s9 = inlined_call_operand.hbm [shape: bf16[256,128], index: 9, kind: input, shape index: {}]   ;;  %s2069_s10 = inlined_call_operand.vmem [shape: f32[1,128], index: 10, kind: input, shape index: {}]   ;;  %s2070_s11 = inlined_call_operand.vmem [shape: f32[2,8,128], index: 11, kind: output, shape index: {}]  }
   0x1   :  { %17 = vsyncpa [#allocation5], 0  ;;  %s1849_s17 = smov 0  }
   0x2 LB: > { %s1781_s18 = smov [#allocation4]   ;;  %s1855_s20 = sadd.s32 4294967295, %s1779_s17   ;;  %s1779_s17 = sphi %s1849_s17, %s23_s17  }
   0x3   : > { %s318_s19 = sshll.u32 %s1781_s18, 4  ;;  %p1390_p0 = scmp.ge.s32.totalorder %s1779_s17, 1  ;;  %s319_s19 = int_to_ptr.vmem [resolvable:$true] %s318_s19 }
   0x4   : > { %p290_p1 = scmp.lt.s32.totalorder %s1779_s17, 3  ;;  %p1553_p2 = scmp.eq.s32.totalorder %s1855_s20, 0 }
   0x5   : > { %s1782_s22 = smov [#allocation2]   ;;  %s1783_s25 = smov [#allocation6]  }
   0x6   : > { %p1860_p3 = pnand %p1390_p0, %p290_p1  ;;  %s302_s23 = sshll.u32 %s1782_s22, 4  ;;  %s1866_s23 = int_to_ptr.vmem [resolvable:$true] %s302_s23 }
   0x7   : > { %s1874_s26 = sshll.u32 %s1783_s25, 4  ;;  %s1698_s27 = scalar_lea.vmem %s319_s19, 2048  ;;  %s347_s26 = int_to_ptr.vmem [resolvable:$true] %s1874_s26 }
   0x8   : > { %p1543_p4 = pneg %p1860_p3  ;;  %p1699_p7 = scmp.ne.s32.totalorder %s319_s19, %s1698_s27 }
   0x9   : > { %p1706_p10 = scmp.lt.s32.totalorder %s319_s19, %s319_s19  ;;  %p1707_p11 = scmp.lt.s32.totalorder %s1698_s27, %s1698_s27 }
   0xa   : > { %p1870_p5 = pnand %p1553_p2, %p1543_p4 }
   0xb   : > { %p1708_p12 = por %p1707_p11, %p1706_p10 }
   0xc   : > { %p1689_p6 = pneg %p1870_p5 }
   0xe   : > { %p1701_p8 = pnand %p1699_p7, %p1689_p6 }
  0x10   : > { %p1702_p9 = pneg %p1701_p8 }
  0x12   : > { %p1709_p13 = pnand %p1708_p12, %p1702_p9 }
  0x14   : > { %1712 = shalt.err (!%p1709_p13)
}
  0x15   : > { %s1784_s28 = smov 128   ;;  %s1785_s29 = smov 8  }
  0x16   : > { %1549 = dma.hbm_to_vmem [thread:$0]  (!%p1870_p5), %s2062_s3, 2048, %s319_s19, [#allocation5], %s1784_s28, %s1784_s28, %s1785_s29  }
  0x17   : > { %s1724_s13 = scalar_lea.vmem %s1866_s23, 2048  ;;  %p1732_p7 = scmp.lt.s32.totalorder %s1866_s23, %s1866_s23 }
  0x18   : > { %p1725_p0 = scmp.ne.s32.totalorder %s1866_s23, %s1724_s13  ;;  %p1733_p8 = scmp.lt.s32.totalorder %s1724_s13, %s1724_s13 }
  0x1a   : > { %p1727_p1 = pnand %p1725_p0, %p1689_p6  ;;  %p1734_p9 = por %p1733_p8, %p1732_p7 }
  0x1c   : > { %p1728_p4 = pneg %p1727_p1 }
  0x1e   : > { %p1735_p10 = pnand %p1734_p9, %p1728_p4 }
  0x20   : > { %1738 = shalt.err (!%p1735_p10)
}
  0x21   : > { %s1786_s14 = smov 64   ;;  %s1787_s15 = smov 4  }
  0x22   : > { %1546 = dma.hbm_to_vmem [thread:$0]  (!%p1870_p5), %s2060_s1, 2048, %s1866_s23, [#allocation3], %s1786_s14, %s1786_s14, %s1787_s15  }
  0x23   : > { %s1750_s19 = scalar_lea.vmem %s347_s26, 2048  ;;  %p1758_p0 = scmp.lt.s32.totalorder %s347_s26, %s347_s26 }
  0x24   : > { %p1751_p11 = scmp.ne.s32.totalorder %s347_s26, %s1750_s19  ;;  %p1759_p1 = scmp.lt.s32.totalorder %s1750_s19, %s1750_s19 }
  0x26   : > { %p1753_p12 = pnand %p1751_p11, %p1689_p6  ;;  %p1760_p4 = por %p1759_p1, %p1758_p0 }
  0x28   : > { %p1754_p13 = pneg %p1753_p12 }
  0x2a   : > { %p1761_p7 = pnand %p1760_p4, %p1754_p13 }
  0x2c   : > { %1764 = shalt.err (!%p1761_p7)
}
  0x2d   : > { %1552 = dma.hbm_to_vmem [thread:$0]  (!%p1870_p5), %s2068_s9, 2048, %s347_s26, [#allocation5], %s1786_s14, %s1786_s14, %s1787_s15  }
  0x2e   : > { %373 = sbr.rel (%p1860_p3) target bundleno = 968 (0x3c8), region = 64 }
  0x33   : > { %1770 = dma.done.wait (%p1553_p2), [#allocation3], 2048  }
  0x34   : > { %1772 = vsyncadd (%p1553_p2), [#allocation3], 4294965248 }
  0x35   : > { %1774 = dma.done.wait (%p1553_p2), [#allocation5], 4096  }
  0x36   : > { %1776 = vsyncadd (%p1553_p2), [#allocation5], 4294963200  ;;  %v1575_v0 = vld [vmem:[#allocation2 + $0x78] sm:$0xff]   ;;  %v1577_v2 = vld [vmem:[#allocation2 + $0x70] sm:$0xff]   ;;  %p420_p5 = scmp.lt.s32.totalorder %s1855_s20, 1  ;;  %v1788_v36 = vmov 0  }
  0x37   : > { %v1576_v1 = vld [vmem:[#allocation2 + $0x38] sm:$0xff]   ;;  %1487 = vmatprep.subr.bf16.mxu0 %v1575_v0  ;;  %v1578_v3 = vld [vmem:[#allocation2 + $0x30] sm:$0xff]   ;;  %v1579_v4 = vld [vmem:[#allocation2 + $0x68] sm:$0xff]   ;;  %738 = vmatprep.mubr.bf16.mxu1 %v1788_v36 }
  0x38   : > { %1488 = vmatpush3.bf16.msra.mxu0 %v1576_v1  ;;  %s2074_s20 = smov (!%p420_p5, %s1855_s20), 1  ;;  %v1580_v5 = vld [vmem:[#allocation2 + $0x28] sm:$0xff]   ;;  %v1581_v6 = vld [vmem:[#allocation2 + $0x60] sm:$0xff]   ;;  %v1583_v8 = vld [vmem:[#allocation2 + $0x58] sm:$0xff]  }
  0x39   : > { %1489 = vmatprep.subr.bf16.mxu0 %v1577_v2  ;;  %s1486_s21 = sshll.u32 %s2074_s20, 4  ;;  %v1582_v7 = vld [vmem:[#allocation2 + $0x20] sm:$0xff]   ;;  %v1584_v9 = vld [vmem:[#allocation2 + $0x18] sm:$0xff]   ;;  %v1585_v10 = vld [vmem:[#allocation2 + $0x50] sm:$0xff]   ;;  %s1401_s14 = sshll.u32 %s2074_s20, 3 }
  0x3a   : > { %s424_s26 = scalar_lea.vmem %s2059_s0, %s1486_s21  ;;  %v1591_v13 = vld [vmem:[#allocation4 + $0x74] ss:$8 sps:$4 sm:$0xff]   ;;  %v1593_v14 = vld [vmem:[#allocation4 + $0x70] ss:$8 sps:$4 sm:$0xff]   ;;  %v1594_v15 = vld [vmem:[#allocation4 + $0x64] ss:$8 sps:$4 sm:$0xff]   ;;  %s428_s22 = scalar_lea.vmem %s2070_s11, %s1401_s14 }
  0x3b   : > { %v431_v11 = vld [vmem:[%s424_s26 + $0x8] sm:$0xff]  ;;  %v1586_v16 = vld [vmem:[#allocation2 + $0x10] sm:$0xff]   ;;  %706 = vmatprep.subr.bf16.mxu1 %v1591_v13  ;;  %v1589_v21 = vld [vmem:[#allocation2 + $0x40] sm:$0xff]  }
  0x3c   : > { %1490 = vmatpush3.bf16.msra.mxu0 %v1578_v3  ;;  %v433_v12 = vpack.c.bf16 %v431_v11, %v431_v11  ;;  %v1587_v17 = vld [vmem:[#allocation2 + $0x48] sm:$0xff]   ;;  %707 = vmatpush1.bf16.msra.mxu1 %v1593_v14  ;;  %v1597_v20 = vld [vmem:[#allocation4 + $0x54] ss:$8 sps:$4 sm:$0xff]   ;;  %v1599_v22 = vld [vmem:[#allocation4 + $0x50] ss:$8 sps:$4 sm:$0xff]  }
  0x3d   : > { %1491 = vmatprep.subr.bf16.mxu0 %v1579_v4  ;;  %v1588_v18 = vld [vmem:[#allocation2 + $0x8] sm:$0xff]   ;;  %708 = vmatprep.subr.bf16.mxu1 %v1594_v15  ;;  %v1590_v24 = vld [vmem:[#allocation2] sm:$0xff]   ;;  %v1603_v27 = vld [vmem:[#allocation4 + $0x34] ss:$8 sps:$4 sm:$0xff]  }
  0x3e   : > { %601 = vmatprep.mubr.bf16.mxu0 %v433_v12  ;;  %v1596_v19 = vld [vmem:[#allocation4 + $0x60] ss:$8 sps:$4 sm:$0xff]   ;;  %v1600_v23 = vld [vmem:[#allocation4 + $0x44] ss:$8 sps:$4 sm:$0xff]   ;;  %v1605_v29 = vld [vmem:[#allocation4 + $0x30] ss:$8 sps:$4 sm:$0xff]  }
  0x3f   : > { %v430_v25 = vld [vmem:[%s424_s26] sm:$0xff]  ;;  %v1609_v32 = vld [vmem:[#allocation4 + $0x14] ss:$8 sps:$4 sm:$0xff]   ;;  %v1611_v33 = vld [vmem:[#allocation4 + $0x10] ss:$8 sps:$4 sm:$0xff]  }
  0x40   : > { %1492 = vmatpush3.bf16.msra.mxu0 %v1580_v5  ;;  %709 = vmatpush1.bf16.msra.mxu1 %v1596_v19  ;;  %v1602_v26 = vld [vmem:[#allocation4 + $0x40] ss:$8 sps:$4 sm:$0xff]   ;;  %v432_v28 = vpack.c.bf16 %v430_v25, %v430_v25  ;;  %v1606_v30 = vld [vmem:[#allocation4 + $0x24] ss:$8 sps:$4 sm:$0xff]   ;;  %v1615_v37 = vld [vmem:[%s2065_s6 + $0x70] ss:$8 sps:$4 sm:$0xff]  }
  0x41   : > { %1493 = vmatprep.subr.bf16.mxu0 %v1581_v6  ;;  %710 = vmatprep.subr.bf16.mxu1 %v1597_v20  ;;  %v1608_v31 = vld [vmem:[#allocation4 + $0x20] ss:$8 sps:$4 sm:$0xff]   ;;  %v1612_v34 = vld [vmem:[#allocation4 + $0x4] ss:$8 sps:$4 sm:$0xff]   ;;  %v1617_v38 = vld [vmem:[%s2065_s6 + $0x74] ss:$8 sps:$4 sm:$0xff]  }
  0x42   : > { %v1614_v35 = vld [vmem:[#allocation4] ss:$8 sps:$4 sm:$0xff]   ;;  %v1620_v39 = vld [vmem:[%s2065_s6 + $0x64] ss:$8 sps:$4 sm:$0xff]   ;;  %v1623_v41 = vld [vmem:[%s2065_s6 + $0x54] ss:$8 sps:$4 sm:$0xff]  }
  0x43   : > { %v1618_v40 = vld [vmem:[%s2065_s6 + $0x60] ss:$8 sps:$4 sm:$0xff]   ;;  %v1621_v42 = vld [vmem:[%s2065_s6 + $0x50] ss:$8 sps:$4 sm:$0xff]   ;;  %v1626_v43 = vld [vmem:[%s2065_s6 + $0x44] ss:$8 sps:$4 sm:$0xff]  }
  0x44   : > { %1494 = vmatpush3.bf16.msra.mxu0 %v1582_v7  ;;  %711 = vmatpush1.bf16.msra.mxu1 %v1599_v22  ;;  %v1624_v44 = vld [vmem:[%s2065_s6 + $0x40] ss:$8 sps:$4 sm:$0xff]   ;;  %v1629_v53 = vld [vmem:[%s2065_s6 + $0x34] ss:$8 sps:$4 sm:$0xff]   ;;  %v1627_v54 = vld [vmem:[%s2065_s6 + $0x30] ss:$8 sps:$4 sm:$0xff]  }
  0x45   : > { %1495 = vmatprep.subr.bf16.mxu0 %v1583_v8  ;;  %712 = vmatprep.subr.bf16.mxu1 %v1600_v23  ;;  %v1402_v46 = vld [vmem:[%s2061_s2] ss:$0 sm:$0xff]  ;;  %v1632_v55 = vld [vmem:[%s2065_s6 + $0x24] ss:$8 sps:$4 sm:$0xff]   ;;  %v1635_v57 = vld [vmem:[%s2065_s6 + $0x14] ss:$8 sps:$4 sm:$0xff]  }
  0x46   : > { %v1630_v56 = vld [vmem:[%s2065_s6 + $0x20] ss:$8 sps:$4 sm:$0xff]   ;;  %v1633_v58 = vld [vmem:[%s2065_s6 + $0x10] ss:$8 sps:$4 sm:$0xff]   ;;  %v1638_v59 = vld [vmem:[%s2065_s6 + $0x4] ss:$8 sps:$4 sm:$0xff]  }
  0x47   : > { %v1636_v60 = vld [vmem:[%s2065_s6] ss:$8 sps:$4 sm:$0xff]   ;;  %v1641_v61 = vld [vmem:[%s2065_s6 + $0xf4] ss:$8 sps:$4 sm:$0xff]   ;;  %v1639_v62 = vld [vmem:[%s2065_s6 + $0xf0] ss:$8 sps:$4 sm:$0xff]  }
  0x48   : > { %1496 = vmatpush3.bf16.msra.mxu0 %v1584_v9  ;;  %713 = vmatpush1.bf16.msra.mxu1 %v1602_v26  ;;  %v1644_v63 = vld [vmem:[%s2065_s6 + $0xe4] ss:$8 sps:$4 sm:$0xff]   ;;  %v1642_v0 = vld [vmem:[%s2065_s6 + $0xe0] ss:$8 sps:$4 sm:$0xff]   ;;  %v1647_v1 = vld [vmem:[%s2065_s6 + $0xd4] ss:$8 sps:$4 sm:$0xff]  }
  0x49   : > { %1497 = vmatprep.subr.bf16.mxu0 %v1585_v10  ;;  %714 = vmatprep.subr.bf16.mxu1 %v1603_v27  ;;  %v1645_v2 = vld [vmem:[%s2065_s6 + $0xd0] ss:$8 sps:$4 sm:$0xff]   ;;  %v1650_v3 = vld [vmem:[%s2065_s6 + $0xc4] ss:$8 sps:$4 sm:$0xff]   ;;  %v1648_v4 = vld [vmem:[%s2065_s6 + $0xc0] ss:$8 sps:$4 sm:$0xff]  }
  0x4a   : > { %v1653_v5 = vld [vmem:[%s2065_s6 + $0xb4] ss:$8 sps:$4 sm:$0xff]   ;;  %v1651_v6 = vld [vmem:[%s2065_s6 + $0xb0] ss:$8 sps:$4 sm:$0xff]   ;;  %v1656_v7 = vld [vmem:[%s2065_s6 + $0xa4] ss:$8 sps:$4 sm:$0xff]  }
  0x4b   : > { %v1654_v8 = vld [vmem:[%s2065_s6 + $0xa0] ss:$8 sps:$4 sm:$0xff]   ;;  %v1657_v9 = vld [vmem:[%s2065_s6 + $0x90] ss:$8 sps:$4 sm:$0xff]   ;;  %v1659_v10 = vld [vmem:[%s2065_s6 + $0x94] ss:$8 sps:$4 sm:$0xff]  }
  0x4c   : > { %1498 = vmatpush3.bf16.msra.mxu0 %v1586_v16  ;;  %715 = vmatpush1.bf16.msra.mxu1 %v1605_v29  ;;  %v1662_v11 = vld [vmem:[%s2065_s6 + $0x84] ss:$8 sps:$4 sm:$0xff]   ;;  %v1660_v12 = vld [vmem:[%s2065_s6 + $0x80] ss:$8 sps:$4 sm:$0xff]  }
  0x4d   : > { %1499 = vmatprep.subr.bf16.mxu0 %v1587_v17  ;;  %716 = vmatprep.subr.bf16.mxu1 %v1606_v30 }
  0x50   : > { %1500 = vmatpush3.bf16.msra.mxu0 %v1588_v18  ;;  %717 = vmatpush1.bf16.msra.mxu1 %v1608_v31 }
  0x51   : > { %1501 = vmatprep.subr.bf16.mxu0 %v1589_v21  ;;  %718 = vmatprep.subr.bf16.mxu1 %v1609_v32 }
  0x54   : > { %1502 = vmatpush3.bf16.msra.mxu0 %v1590_v24  ;;  %719 = vmatpush1.bf16.msra.mxu1 %v1611_v33 }
  0x55   : > { %720 = vmatprep.subr.bf16.mxu1 %v1612_v34  ;;  %1013 = vmatprep.subr.bf16.mxu0 %v1617_v38 }
  0x57   : > { %602 = vmatmul.mubr.bf16.vlgmr.msra.gmra.mxu0 %v432_v28 }
  0x58   : > { %721 = vmatpush1.bf16.msra.mxu1 %v1614_v35  ;;  %1014 = vmatpush1.bf16.msra.mxu0 %v1615_v37 }
  0x59   : > { %1015 = vmatprep.subr.bf16.mxu0 %v1620_v39 }
  0x5c   : > { %1016 = vmatpush1.bf16.msra.mxu0 %v1618_v40 }
  0x5d   : > { %1017 = vmatprep.subr.bf16.mxu0 %v1623_v41 }
  0x60   : > { %1018 = vmatpush1.bf16.msra.mxu0 %v1621_v42 }
  0x61   : > { %1019 = vmatprep.subr.bf16.mxu0 %v1626_v43 }
  0x64   : > { %1020 = vmatpush1.bf16.msra.mxu0 %v1624_v44 }
  0x65   : > { %1021 = vmatprep.subr.bf16.mxu0 %v1629_v53 }
  0x68   : > { %1022 = vmatpush1.bf16.msra.mxu0 %v1627_v54 }
  0x69   : > { %1023 = vmatprep.subr.bf16.mxu0 %v1632_v55 }
  0x6c   : > { %1024 = vmatpush1.bf16.msra.mxu0 %v1630_v56  ;;  %v747_v56 = vld [vmem:[%s2063_s4] sm:$0x3] }
  0x6d   : > { %1025 = vmatprep.subr.bf16.mxu0 %v1635_v57  ;;  %v748_v57 = vld [vmem:[%s2064_s5] sm:$0x3] }
  0x70   : > { %1026 = vmatpush1.bf16.msra.mxu0 %v1633_v58 }
  0x71   : > { %1027 = vmatprep.subr.bf16.mxu0 %v1638_v59 }
  0x74   : > { %1028 = vmatpush1.bf16.msra.mxu0 %v1636_v60 }
  0x75   : > { %1029 = vmatprep.subr.bf16.mxu0 %v1641_v61 }
  0x78   : > { %1030 = vmatpush2.bf16.msra.mxu0 %v1639_v62 }
  0x79   : > { %1031 = vmatprep.subr.bf16.mxu0 %v1644_v63 }
  0x7c   : > { %1032 = vmatpush2.bf16.msra.mxu0 %v1642_v0 }
  0x7d   : > { %1033 = vmatprep.subr.bf16.mxu0 %v1647_v1 }
  0x80   : > { %1034 = vmatpush2.bf16.msra.mxu0 %v1645_v2 }
  0x81   : > { %1035 = vmatprep.subr.bf16.mxu0 %v1650_v3 }
  0x84   : > { %1036 = vmatpush2.bf16.msra.mxu0 %v1648_v4 }
  0x85   : > { %1037 = vmatprep.subr.bf16.mxu0 %v1653_v5 }
  0x88   : > { %1038 = vmatpush2.bf16.msra.mxu0 %v1651_v6 }
  0x89   : > { %1039 = vmatprep.subr.bf16.mxu0 %v1656_v7 }
  0x8c   : > { %1040 = vmatpush2.bf16.msra.mxu0 %v1654_v8 }
  0x8d   : > { %1041 = vmatprep.subr.bf16.mxu0 %v1659_v10 }
  0x90   : > { %1042 = vmatpush2.bf16.msra.mxu0 %v1657_v9 }
  0x91   : > { %1043 = vmatprep.subr.bf16.mxu0 %v1662_v11 }
  0x94   : > { %1044 = vmatpush2.bf16.msra.mxu0 %v1660_v12 }
 0x117   : > { %v1503_v45 = vpop.f32.mrf.mxu0 }
 0x119   : > { %v1504_v47 = vpop.f32.mrf.mxu0 }
 0x11a   : > { %v1505_v48 = vadd.f32 %v1504_v47, %v1503_v45 }
 0x11b   : > { %v1506_v49 = vpop.f32.mrf.mxu0 }
 0x11c   : > { %v604_v50 = vadd.f32 %v1505_v48, %v1402_v46 }
 0x11d   : > { %v1507_v51 = vpop.f32.mrf.mxu0 }
 0x11e   : > { %v609_v52 = vpack.c.bf16 %v604_v50, %v604_v50 }
 0x120   : > { %739 = vmatmul.mubr.bf16.vlgmr.msra.gmra.mxu1 %v609_v52  ;;  %v792_v52 = vlaneseq }
 0x122   : > { %v793_v54 = vshrl.u32 %v792_v52, 7 }
 0x124   : > { %v2025_v55 = vsub.s32 0, %v793_v54  ;;  %v2033_v58 = vsub.s32 1, %v793_v54 }
 0x126   : > { %v795_v60 = vrot.slane %v747_v56, %v2025_v55  ;;  %v808_v63 = vrot.slane %v748_v57, %v2025_v55  ;;  %v799_v1 = vrot.slane %v747_v56, %v2033_v58  ;;  %v812_v5 = vrot.slane %v748_v57, %v2033_v58 }
 0x1e0   : > { %v740_v13 = vpop.f32.mrf.mxu1 }
 0x1e1   : > { %v749_v14 = vrot.slane %v740_v13, 4  ;;  %v761_v15 = vmul.f32 %v740_v13, %v740_v13 }
 0x1e2   : > { %v742_v16 = vpop.f32.mrf.mxu1 }
 0x1e3   : > { %v750_v17 = vadd.f32 %v749_v14, %v740_v13  ;;  %v763_v18 = vrot.slane %v761_v15, 4  ;;  %v755_v19 = vrot.slane %v742_v16, 4  ;;  %v762_v20 = vmul.f32 %v742_v16, %v742_v16  ;;  %v1664_v14 = vld [vmem:[#allocation6 + $0x38] sm:$0xff]  }
 0x1e4   : > { %v744_v21 = vpop.f32.mrf.mxu1 }
 0x1e5   : > { %v751_v22 = vrot.slane %v750_v17, 2  ;;  %v764_v23 = vadd.f32 %v763_v18, %v761_v15  ;;  %v756_v24 = vadd.f32 %v755_v19, %v742_v16  ;;  %v769_v25 = vrot.slane %v762_v20, 4  ;;  %v1665_v15 = vld [vmem:[#allocation6 + $0x70] sm:$0xff]   ;;  %v1668_v18 = vld [vmem:[#allocation6 + $0x28] sm:$0xff]   ;;  %v1669_v19 = vld [vmem:[#allocation6 + $0x60] sm:$0xff]  }
 0x1e6   : > { %v745_v26 = vpop.f32.mrf.mxu1  ;;  %v1671_v21 = vld [vmem:[#allocation6 + $0x58] sm:$0xff]  }
 0x1e7   : > { %v752_v27 = vadd.f32 %v751_v22, %v750_v17  ;;  %v765_v28 = vrot.slane %v764_v23, 2  ;;  %v757_v29 = vrot.slane %v756_v24, 2  ;;  %v770_v30 = vadd.f32 %v769_v25, %v762_v20  ;;  %v1667_v17 = vld [vmem:[#allocation6 + $0x68] sm:$0xff]   ;;  %v1670_v20 = vld [vmem:[#allocation6 + $0x20] sm:$0xff]   ;;  %v1672_v22 = vld [vmem:[#allocation6 + $0x18] sm:$0xff]  }
 0x1e8   : > { %v1675_v25 = vld [vmem:[#allocation6 + $0x48] sm:$0xff]  }
 0x1e9   : > { %v753_v31 = vrot.slane %v752_v27, 1  ;;  %v766_v32 = vadd.f32 %v765_v28, %v764_v23  ;;  %v758_v33 = vadd.f32 %v757_v29, %v756_v24  ;;  %v771_v34 = vrot.slane %v770_v30, 2  ;;  %v1673_v23 = vld [vmem:[#allocation6 + $0x50] sm:$0xff]   ;;  %v1676_v26 = vld [vmem:[#allocation6 + $0x8] sm:$0xff]   ;;  %v1678_v28 = vld [vmem:[#allocation6] sm:$0xff]  }
 0x1ea   : > { %v1674_v24 = vld [vmem:[#allocation6 + $0x10] sm:$0xff]  }
 0x1eb   : > { %v754_v35 = vadd.f32 %v753_v31, %v752_v27  ;;  %v767_v36 = vrot.slane %v766_v32, 1  ;;  %v759_v37 = vrot.slane %v758_v33, 1  ;;  %v772_v38 = vadd.f32 %v771_v34, %v770_v30  ;;  %v1677_v27 = vld [vmem:[#allocation6 + $0x40] sm:$0xff]  }
 0x1ed   : > { %v768_v39 = vadd.f32 %v767_v36, %v766_v32  ;;  %v775_v40 = vmul.f32 0.125, %v754_v35  ;;  %v760_v41 = vadd.f32 %v759_v37, %v758_v33  ;;  %v773_v42 = vrot.slane %v772_v38, 1 }
 0x1ef   : > { %v777_v43 = vmul.f32 0.125, %v768_v39  ;;  %v779_v44 = vmul.f32 %v775_v40, %v775_v40  ;;  %v774_v45 = vadd.f32 %v773_v42, %v772_v38  ;;  %v776_v46 = vmul.f32 0.125, %v760_v41 }
 0x1f0   : > { %v783_v59 = vsub.f32 %v740_v13, %v775_v40  ;;  %v1663_v13 = vld [vmem:[#allocation6 + $0x78] sm:$0xff]  }
 0x1f1   : > { %v781_v47 = vsub.f32 %v777_v43, %v779_v44  ;;  %v778_v48 = vmul.f32 0.125, %v774_v45  ;;  %v780_v49 = vmul.f32 %v776_v46, %v776_v46  ;;  %v784_v0 = vsub.f32 %v742_v16, %v776_v46  ;;  %1509 = vmatprep.subr.bf16.mxu1 %v1663_v13  ;;  %v1666_v16 = vld [vmem:[#allocation6 + $0x30] sm:$0xff]  }
 0x1f2   : > { %1510 = vmatpush3.bf16.msra.mxu1 %v1664_v14 }
 0x1f3   : > { %v785_v50 = vadd.f32 1e-05, %v781_v47  ;;  %v782_v51 = vsub.f32 %v778_v48, %v780_v49  ;;  %1511 = vmatprep.subr.bf16.mxu1 %v1665_v15 }
 0x1f5   : > { %1679 = vrsqrt.f32 %v785_v50  ;;  %v786_v53 = vadd.f32 1e-05, %v782_v51 }
 0x1f6   : > { %1512 = vmatpush3.bf16.msra.mxu1 %v1666_v16 }
 0x1f7   : > { %1681 = vrsqrt.f32 %v786_v53  ;;  %1513 = vmatprep.subr.bf16.mxu1 %v1667_v17 }
 0x1fa   : > { %1514 = vmatpush3.bf16.msra.mxu1 %v1668_v18 }
 0x1fb   : > { %1515 = vmatprep.subr.bf16.mxu1 %v1669_v19 }
 0x1fe   : > { %1516 = vmatpush3.bf16.msra.mxu1 %v1670_v20 }
 0x1ff   : > { %1517 = vmatprep.subr.bf16.mxu1 %v1671_v21 }
 0x202   : > { %v1680_v61 = vpop.eup %1679  ;;  %1518 = vmatpush3.bf16.msra.mxu1 %v1672_v22 }
 0x203   : > { %v789_v62 = vmul.f32 %v1680_v61, %v783_v59  ;;  %1519 = vmatprep.subr.bf16.mxu1 %v1673_v23 }
 0x204   : > { %v1682_v2 = vpop.eup %1681 }
 0x205   : > { %v802_v3 = vmul.f32 %v795_v60, %v789_v62  ;;  %v790_v4 = vmul.f32 %v1682_v2, %v784_v0 }
 0x206   : > { %1520 = vmatpush3.bf16.msra.mxu1 %v1674_v24 }
 0x207   : > { %v815_v6 = vadd.f32 %v808_v63, %v802_v3  ;;  %v803_v7 = vmul.f32 %v799_v1, %v790_v4  ;;  %1521 = vmatprep.subr.bf16.mxu1 %v1675_v25 }
 0x209   : > { %v816_v8 = vadd.f32 %v812_v5, %v803_v7  ;;  %v817_v9 = vmax.f32 %v815_v6, 0.0  ;;  %v1054_v7 = vld [vmem:[%s2066_s7] sm:$0x3] }
 0x20a   : > { %1522 = vmatpush3.bf16.msra.mxu1 %v1676_v26  ;;  %v1106_v15 = vrot.slane %v1054_v7, %v2033_v58 }
 0x20b   : > { %v818_v10 = vmax.f32 %v816_v8, 0.0  ;;  %v819_v12 = vpack.c.bf16 %v817_v9, %v817_v9  ;;  %1523 = vmatprep.subr.bf16.mxu1 %v1677_v27  ;;  %v1055_v8 = vld [vmem:[%s2067_s8] sm:$0x3] }
 0x20c   : > { %v1115_v13 = vrot.slane %v1055_v8, %v2025_v55  ;;  %v1119_v19 = vrot.slane %v1055_v8, %v2033_v58 }
 0x20d   : > { %v820_v11 = vpack.c.bf16 %v818_v10, %v818_v10  ;;  %v1102_v10 = vrot.slane %v1054_v7, %v2025_v55  ;;  %v1467_v55 = vld [vmem:[%s2069_s10] ss:$0 sm:$0xff] }
 0x20e   : > { %1524 = vmatpush3.bf16.msra.mxu1 %v1678_v28 }
 0x20f   : > { %1045 = vmatprep.mubr.bf16.mxu0 %v820_v11 }
 0x210   : > { %1046 = vmatmul.mubr.bf16.vlgmr.msra.gmra.mxu0 %v819_v12 }
 0x2d0   : > { %v1047_v29 = vpop.f32.mrf.mxu0 }
 0x2d1   : > { %v1056_v30 = vrot.slane %v1047_v29, 4  ;;  %v1068_v31 = vmul.f32 %v1047_v29, %v1047_v29 }
 0x2d2   : > { %v1049_v32 = vpop.f32.mrf.mxu0 }
 0x2d3   : > { %v1057_v33 = vadd.f32 %v1056_v30, %v1047_v29  ;;  %v1070_v34 = vrot.slane %v1068_v31, 4  ;;  %v1062_v35 = vrot.slane %v1049_v32, 4  ;;  %v1069_v36 = vmul.f32 %v1049_v32, %v1049_v32 }
 0x2d4   : > { %v1051_v37 = vpop.f32.mrf.mxu0 }
 0x2d5   : > { %v1058_v38 = vrot.slane %v1057_v33, 2  ;;  %v1071_v39 = vadd.f32 %v1070_v34, %v1068_v31  ;;  %v1063_v40 = vadd.f32 %v1062_v35, %v1049_v32  ;;  %v1076_v41 = vrot.slane %v1069_v36, 4 }
 0x2d6   : > { %v1052_v42 = vpop.f32.mrf.mxu0 }
 0x2d7   : > { %v1059_v43 = vadd.f32 %v1058_v38, %v1057_v33  ;;  %v1072_v44 = vrot.slane %v1071_v39, 2  ;;  %v1064_v45 = vrot.slane %v1063_v40, 2  ;;  %v1077_v46 = vadd.f32 %v1076_v41, %v1069_v36 }
 0x2d9   : > { %v1060_v47 = vrot.slane %v1059_v43, 1  ;;  %v1073_v48 = vadd.f32 %v1072_v44, %v1071_v39  ;;  %v1065_v49 = vadd.f32 %v1064_v45, %v1063_v40  ;;  %v1078_v50 = vrot.slane %v1077_v46, 2 }
 0x2db   : > { %v1061_v51 = vadd.f32 %v1060_v47, %v1059_v43  ;;  %v1074_v52 = vrot.slane %v1073_v48, 1  ;;  %v1066_v53 = vrot.slane %v1065_v49, 1  ;;  %v1079_v54 = vadd.f32 %v1078_v50, %v1077_v46 }
 0x2dd   : > { %v1075_v56 = vadd.f32 %v1074_v52, %v1073_v48  ;;  %v1082_v57 = vmul.f32 0.125, %v1061_v51  ;;  %v1067_v59 = vadd.f32 %v1066_v53, %v1065_v49  ;;  %v1080_v60 = vrot.slane %v1079_v54, 1 }
 0x2df   : > { %v1084_v61 = vmul.f32 0.125, %v1075_v56  ;;  %v1086_v62 = vmul.f32 %v1082_v57, %v1082_v57  ;;  %v1081_v63 = vadd.f32 %v1080_v60, %v1079_v54  ;;  %v1083_v0 = vmul.f32 0.125, %v1067_v59 }
 0x2e0   : > { %v1090_v9 = vsub.f32 %v1047_v29, %v1082_v57 }
 0x2e1   : > { %v1088_v1 = vsub.f32 %v1084_v61, %v1086_v62  ;;  %v1085_v2 = vmul.f32 0.125, %v1081_v63  ;;  %v1087_v3 = vmul.f32 %v1083_v0, %v1083_v0  ;;  %v1091_v14 = vsub.f32 %v1049_v32, %v1083_v0 }
 0x2e3   : > { %v1092_v4 = vadd.f32 1e-05, %v1088_v1  ;;  %v1089_v5 = vsub.f32 %v1085_v2, %v1087_v3 }
 0x2e5   : > { %1683 = vrsqrt.f32 %v1092_v4  ;;  %v1093_v6 = vadd.f32 1e-05, %v1089_v5 }
 0x2e7   : > { %1685 = vrsqrt.f32 %v1093_v6 }
 0x2f2   : > { %v1684_v11 = vpop.eup %1683 }
 0x2f3   : > { %v1096_v12 = vmul.f32 %v1684_v11, %v1090_v9 }
 0x2f4   : > { %v1686_v16 = vpop.eup %1685 }
 0x2f5   : > { %v1109_v17 = vmul.f32 %v1102_v10, %v1096_v12  ;;  %v1097_v18 = vmul.f32 %v1686_v16, %v1091_v14 }
 0x2f7   : > { %v1122_v20 = vadd.f32 %v1115_v13, %v1109_v17  ;;  %v1110_v21 = vmul.f32 %v1106_v15, %v1097_v18 }
 0x2f9   : > { %v1123_v22 = vadd.f32 %v1119_v19, %v1110_v21  ;;  %v1124_v23 = vmax.f32 %v1122_v20, 0.0 }
 0x2fb   : > { %v1125_v24 = vmax.f32 %v1123_v22, 0.0  ;;  %v1126_v26 = vpack.c.bf16 %v1124_v23, %v1124_v23 }
 0x2fd   : > { %v1127_v25 = vpack.c.bf16 %v1125_v24, %v1125_v24 }
 0x2ff   : > { %1295 = vmatprep.mubr.bf16.mxu1 %v1127_v25 }
 0x300   : > { %1296 = vmatmul.mubr.bf16.vlgmr.msra.gmra.mxu1 %v1126_v26 }
 0x3c0   : > { %v1525_v27 = vpop.f32.mrf.mxu1 }
 0x3c2   : > { %v1526_v28 = vpop.f32.mrf.mxu1 }
 0x3c3   : > { %v1527_v29 = vadd.f32 %v1526_v28, %v1525_v27 }
 0x3c4   : > { %v1528_v58 = vpop.f32.mrf.mxu1 }
 0x3c5   : > { %v1298_v30 = vadd.f32 %v1527_v29, %v1467_v55 }
 0x3c6   : > { %v1529_v31 = vpop.f32.mrf.mxu1 }
 0x3c7   : > { %1303 = vst [vmem:[%s428_s22] sm:$0xff] %v1298_v30 }
 0x3c8 PF: > { %s23_s17 = sadd.s32 1, %s1779_s17  }
 0x3c9   : > { %p20_p2 = scmp.ge.s32.totalorder %s23_s17, 4  }
 0x3cb   :  { %22 = sbr.rel (!%p20_p2) target bundleno = 2 (0x2), region = 107 }
 0x3d0   :  { %1323 = vsyncpa [#allocation3], 1 }
 0x3d1   :  { %1325 = vsyncpa [#allocation3 + $0x1], 1 }
 0x3d2   :  { %1326 = vsyncpa [#allocation5], 1 }

</bundles_post_ra>
